<compile_context>
chip_gen: v5e
topology: v5e:2x2
jax: 0.10.0
libtpu: 0.0.40
codegen_flags: <defaults>
</compile_context>

<pallas_src>
import jax
import jax.numpy as jnp
from jax.experimental import pallas as pl
from jax.experimental.pallas import tpu as pltpu


def _srs_kernel(scale_ref, x_ref, o_ref):
    # scale_ref: (2,) f32 in SMEM = [1/a, 1/b]; x_ref/o_ref: (TM, 128) tiles
    # in the input's native dtype.
    inv_a = scale_ref[0]
    inv_b = scale_ref[1]
    x = x_ref[...].astype(jnp.float32)
    denom = x * inv_a + jnp.exp(x * (-inv_b))   # VPU mul/add + EUP exp
    o_ref[...] = (x / denom).astype(o_ref.dtype)


def srs(x, a, b, *, tile_rows=4096):
    """Elementwise SRS activation. x: any shape (e.g. NCHW). a, b: scalars."""
    orig_shape = x.shape
    LANES = 128

    # The formula is a float activation; promote non-float inputs once.
    if not jnp.issubdtype(x.dtype, jnp.floating):
        x = x.astype(jnp.float32)
    dtype = x.dtype

    total = x.size
    rows = pl.cdiv(total, LANES)
    rows8 = max(8, ((rows + 7) // 8) * 8)          # sublane-aligned row count

    # Clamp the tile to the data, keep it a multiple of 8 rows, and prefer at
    # least 2 grid steps so a "parallel" grid axis can use both v7x cores.
    tile_rows = min(tile_rows, rows8)
    if rows8 >= 16 and rows8 <= tile_rows:
        tile_rows = max(8, (((rows8 + 1) // 2 + 7) // 8) * 8)

    padded_rows = pl.cdiv(rows, tile_rows) * tile_rows
    padded_total = padded_rows * LANES

    x_flat = jnp.ravel(x)
    pad = padded_total - total
    if pad:
        # Only taken for ragged sizes; zero pad is safe for this formula.
        x_flat = jnp.pad(x_flat, (0, pad))
    x2d = x_flat.reshape(padded_rows, LANES)

    # Reciprocals computed once on the host/scalar side -> in-kernel multiplies.
    scales = jnp.asarray([1.0 / a, 1.0 / b], dtype=jnp.float32)

    out2d = pl.pallas_call(
        _srs_kernel,
        out_shape=jax.ShapeDtypeStruct((padded_rows, LANES), dtype),
        grid_spec=pltpu.PrefetchScalarGridSpec(
            num_scalar_prefetch=0,
            grid=(padded_rows // tile_rows,),
            in_specs=[
                pl.BlockSpec(memory_space=pltpu.SMEM),              # [1/a, 1/b]
                pl.BlockSpec((tile_rows, LANES), lambda i: (i, 0)),  # x tile
            ],
            out_specs=pl.BlockSpec((tile_rows, LANES), lambda i: (i, 0)),
        ),
        compiler_params=pltpu.CompilerParams(
            dimension_semantics=("parallel",),
            # 2 MiB/buffer * (in + out) * double-buffering = 8 MiB + headroom;
            # 32 MiB is valid on v5e/v6e/v7x scoped VMEM.
            vmem_limit_bytes=32 << 20,
        ),
    )(scales, x2d)

    if pad:
        return out2d.reshape(-1)[:total].reshape(orig_shape)
    return out2d.reshape(orig_shape)


if __name__ == "__main__":
    key = jax.random.PRNGKey(0)
    # NCHW input, consistent with typical conv-activation usage.
    x = jax.random.normal(key, (2, 4, 16, 16), dtype=jnp.float32)
    a = 5.0
    b = 3.0

    out = srs(x, a, b)
    out = jax.block_until_ready(out)

    # Reference check in plain JAX (same formula as the PyTorch module).
    ref = x / (x / a + jnp.exp(-x / b))
    assert out.shape == x.shape and out.dtype == x.dtype
    assert jnp.allclose(out, ref, atol=1e-5, rtol=1e-5)

    print("KERNEL_OK")
</pallas_src>

<mosaic_0001>
module attributes {stable_mosaic.version = 11 : i64} {
  func.func @_srs_kernel(%arg0: i32, %arg1: memref<2xf32, #tpu.memory_space<smem>>, %arg2: memref<8x128xf32, #tpu.memory_space<vmem>>, %arg3: memref<8x128xf32, #tpu.memory_space<vmem>>) attributes {dimension_semantics = [#tpu.dimension_semantics<parallel>], iteration_bounds = array<i64: 2>, scalar_prefetch = 0 : i64, scratch_operands = 0 : i64, tpu.core_type = #tpu.core_type<tc>, window_params = [{transform_indices = @transform_0, window_bounds = array<i64: 2>}, {transform_indices = @transform_1, window_bounds = array<i64: 8, 128>}, {transform_indices = @transform_2, window_bounds = array<i64: 8, 128>}]} {
    %c0 = arith.constant 0 : index
    %0 = memref.load %arg1[%c0] : memref<2xf32, #tpu.memory_space<smem>>
    %c1 = arith.constant 1 : index
    %1 = memref.load %arg1[%c1] : memref<2xf32, #tpu.memory_space<smem>>
    %c0_0 = arith.constant 0 : index
    %c0_1 = arith.constant 0 : index
    %2 = vector.load %arg2[%c0_0, %c0_1] : memref<8x128xf32, #tpu.memory_space<vmem>>, vector<8x128xf32>
    %3 = vector.broadcast %0 : f32 to vector<8x128xf32>
    %4 = arith.mulf %2, %3 : vector<8x128xf32>
    %cst = arith.constant 0.000000e+00 : f32
    %5 = arith.subf %cst, %1 : f32
    %6 = vector.broadcast %5 : f32 to vector<8x128xf32>
    %7 = arith.mulf %2, %6 : vector<8x128xf32>
    %8 = math.exp %7 : vector<8x128xf32>
    %9 = arith.addf %4, %8 : vector<8x128xf32>
    %10 = arith.divf %2, %9 : vector<8x128xf32>
    %c0_2 = arith.constant 0 : index
    %c0_3 = arith.constant 0 : index
    %11 = vector.load %arg3[%c0_2, %c0_3] : memref<8x128xf32, #tpu.memory_space<vmem>>, vector<8x128xf32>
    tpu.vector_store %arg3[%c0_2, %c0_3], %10 {strides = array<i32>} : memref<8x128xf32, #tpu.memory_space<vmem>>, vector<8x128xf32>,
    return
  }
  func.func @transform_0(%arg0: i32) -> i32 {
    %c0_i32 = arith.constant 0 : i32
    %c0_i32_0 = arith.constant 0 : i32
    return %c0_i32 : i32
  }
  func.func @transform_1(%arg0: i32) -> (i32, i32) {
    %c0_i32 = arith.constant 0 : i32
    %c0_i32_0 = arith.constant 0 : i32
    return %arg0, %c0_i32 : i32, i32
  }
  func.func @transform_2(%arg0: i32) -> (i32, i32) {
    %c0_i32 = arith.constant 0 : i32
    %c0_i32_0 = arith.constant 0 : i32
    return %arg0, %c0_i32 : i32, i32
  }
}

</mosaic_0001>

<bundles_post_ra>
// kernel: tpu_custom_call.1
= control target key start
LH: loop header
LB: loop body
LE: loop exit
PB: predicated region body
PF: predicated region fallthrough
CT: control target
= control target key end

     0   :  { %7 = vsyncpa [#allocation5], 0  ;;  %s651_s0 = inlined_call_operand.hbm [shape: f32[2], index: 0, kind: input, shape index: {}]   ;;  %s652_s1 = inlined_call_operand.hbm [shape: f32[16,128], index: 1, kind: input, shape index: {}]   ;;  %s653_s2 = inlined_call_operand.hbm [shape: f32[16,128], index: 2, kind: output, shape index: {}]  }
   0x1   :  { %8 = vsyncpa [#allocation3], 0 }
   0x2   :  { %10 = vsyncpa [#allocation3 + $0x1], 0 }
   0x3   :  { %11 = vsyncpa [#allocation4], 0 }
   0x4   :  { %13 = vsyncpa [#allocation4 + $0x1], 0  ;;  %s509_s9 = smov 0   ;;  %s511_s10 = smov 0  }
   0x5   :  { %s513_s11 = smov 0   ;;  %s515_s12 = smov 0  }
   0x6 LB: > { %s530_s13 = sadd.s32 4294967295, %s491_s12   ;;  %s300_s14 = sadd.s32 4294967294, %s491_s12   ;;  %s491_s12 = sphi %s515_s12, %s663_s12   ;;  %s487_s11 = sphi %s513_s11, %s662_s11   ;;  %s483_s10 = sphi %s511_s10, %s661_s10   ;;  %s479_s9 = sphi %s509_s9, %s660_s9  }
   0x7   : > { %p60_p0 = scmp.ne.s32.totalorder %s483_s10, %s479_s9  ;;  %p61_p1 = scmp.eq.s32.totalorder %s530_s13, 0 }
   0x8   : > { %p84_p2 = scmp.eq.s32.totalorder %s530_s13, 1  ;;  %p90_p3 = scmp.eq.s32.totalorder %s300_s14, 1 }
   0x9   : > { %p539_p4 = por %p61_p1, %p60_p0  ;;  %p301_p5 = scmp.ge.s32.totalorder %s491_s12, 1 }
   0xa   : > { %p544_p6 = por %p90_p3, %p60_p0  ;;  %p97_p7 = scmp.lt.s32.totalorder %s491_s12, 3 }
   0xb   : > { %s109_s19 = sshll.u32 %s651_s0, 4  ;;  %s560_s21 = sadd.s32 1, %s491_s12   ;;  %s110_s19 = int_to_ptr.hbm [resolvable:$true] %s109_s19 }
   0xc   : > { %p552_p8 = pnand %p301_p5, %p97_p7  ;;  %s44_s22 = ssub.s32 %s491_s12, %s560_s21 }
   0xd   : > { %p45_p12 = scmp.eq.s32.totalorder %s44_s22, 0  ;;  %s47_s23 = sadd.s32 1, %s487_s11 }
   0xe   : > { %p323_p10 = pneg %p552_p8  ;;  %p54_p13 = scmp.ne.s32.totalorder %s487_s11, %s483_s10 }
   0xf   : > { %s493_s24 = smov [#allocation2]   ;;  %p55_p0 = scmp.eq.s32.totalorder %s491_s12, 0 }
  0x10   : > { %p324_p11 = pnand %p323_p10, %p61_p1  ;;  %p575_p3 = por %p84_p2, %p54_p13 }
  0x11   : > { %s570_s25 = scalar_select %p45_p12, %s487_s11, %s47_s23  }
  0x12   : > { %326 = dma.hbm_to_smem (!%p324_p11), %s110_s19, 16, %s493_s24, [#allocation5]  }
  0x13   : > { %s120_s27 = sand.u32 1, %s487_s11   ;;  %p56_p5 = por %p55_p0, %p54_p13 }
  0x14   : > { %p336_p7 = scmp.lt.s32.totalorder %s491_s12, 2  ;;  %s304_s28 = sshll.u32 %s120_s27, 3 }
  0x15   : > { %s305_s29 = sshll.u32 %s491_s12, 3  ;;  %s124_s6 = scalar_lea.vmem [#allocation6], %s304_s28 }
  0x16   : > { %s128_s4 = scalar_lea.hbm %s652_s1, %s305_s29  ;;  %s132_s7 = sshll.u32 %s124_s6, 4  ;;  %s133_s7 = int_to_ptr.vmem [resolvable:$true] %s132_s7 }
  0x17   : > { %s130_s5 = sshll.u32 %s128_s4, 4  ;;  %p585_p10 = pnand %p336_p7, %p56_p5  ;;  %s131_s5 = int_to_ptr.hbm [resolvable:$true] %s130_s5 }
  0x18   : > { %s121_s14 = scalar_lea.sflag [#allocation3], %s120_s27  ;;  %s391_s17 = sshra.s32 %s131_s5, 4  ;;  %s392_s17 = int_to_ptr.hbm [resolvable:$true] %s391_s17 }
  0x19   : > { %s393_s18 = scalar_lea.hbm %s392_s17, 8  ;;  %p395_p11 = pneg %p585_p10 }
  0x1a   : > { %p394_p2 = scmp.ne.s32.totalorder %s392_s17, %s393_s18  ;;  %s398_s23 = scalar_lea.hbm %s652_s1, 16 }
  0x1b   : > { %p399_p0 = scmp.lt.s32.totalorder %s392_s17, %s652_s1  ;;  %p400_p5 = scmp.lt.s32.totalorder %s398_s23, %s393_s18 }
  0x1c   : > { %p396_p12 = pnand %p395_p11, %p394_p2 }
  0x1d   : > { %p401_p7 = por %p400_p5, %p399_p0 }
  0x1e   : > { %p397_p13 = pneg %p396_p12 }
  0x20   : > { %p402_p9 = pnand %p401_p7, %p397_p13 }
  0x22   : > { %405 = shalt.err (!%p402_p9)
}
  0x23   : > { %330 = dma.hbm_to_vmem [thread:$0]  (!%p585_p10), %s131_s5, 128, %s133_s7, %s121_s14  }
  0x24   : > { %141 = sbr.rel (%p552_p8) target bundleno = 92 (0x5c), region = 28 }
  0x29   : > { %466 = dma.done.wait (%p61_p1), [#allocation5], 16  }
  0x2a   : > { %468 = vsyncadd (%p61_p1), [#allocation5], 4294967280  ;;  %s606_s27 = sand.u32 1, %s483_s10  }
  0x2b   : > { %s308_s29 = sshll.u32 %s606_s27, 3  ;;  %s149_s30 = scalar_lea.sflag [#allocation3], %s606_s27 }
  0x2c   : > { %s152_s3 = scalar_lea.vmem [#allocation6], %s308_s29 }
  0x2d   : > { %470 = dma.done.wait (%p539_p4), %s149_s30, 128  }
  0x2e   : > { %472 = vsyncadd (%p539_p4), %s149_s30, 4294967168 }
  0x2f   : > { %158 = sfence }
  0x30   : > { %s310_s20 = sld [smem:[#allocation2 + $0x1]]  ;;  %v177_v0 = vld [vmem:[%s152_s3] sm:$0xff]  ;;  %s312_s15 = sshll.u32 %s530_s13, 3 }
  0x31   : > { %s175_s4 = sld [smem:[#allocation2]]  ;;  %s213_s8 = scalar_lea.hbm %s653_s2, %s312_s15 }
  0x32   : > { %s174_s14 = scalar_lea.vmem [#allocation7], %s308_s29  ;;  %s217_s18 = sshll.u32 %s213_s8, 4  ;;  %s218_s18 = int_to_ptr.hbm [resolvable:$true] %s217_s18 }
  0x33   : > { %s215_s17 = sshll.u32 %s174_s14, 4  ;;  %s203_s13 = scalar_lea.sflag [#allocation4], %s606_s27  ;;  %s216_s17 = int_to_ptr.vmem [resolvable:$true] %s215_s17 }
  0x34   : > { %s435_s19 = sshra.s32 %s218_s18, 4  ;;  %s441_s28 = scalar_lea.hbm %s653_s2, 16  ;;  %s436_s19 = int_to_ptr.hbm [resolvable:$true] %s435_s19 }
  0x35   : > { %s437_s22 = scalar_lea.hbm %s436_s19, 8  ;;  %p442_p9 = scmp.lt.s32.totalorder %s436_s19, %s653_s2 }
  0x36   : > { %s180_s5 = ssub.f32 0.0, %s310_s20  ;;  %p438_p1 = scmp.ne.s32.totalorder %s436_s19, %s437_s22 }
  0x37   : > { %v178_v4 = vstv %s175_s4  ;;  %p443_p10 = scmp.lt.s32.totalorder %s441_s28, %s437_s22 }
  0x38   : > { %v181_v1 = vstv %s180_s5  ;;  %v179_v5 = vmul.f32 %v178_v4, %v177_v0  ;;  %p439_p4 = pnand %p438_p1, %p575_p3 }
  0x39   : > { %v182_v2 = vmul.f32 %v181_v1, %v177_v0  ;;  %p444_p2 = por %p443_p10, %p442_p9 }
  0x3a   : > { %p440_p8 = pneg %p439_p4 }
  0x3b   : > { %v183_v3 = vmul.f32 1.442695, %v182_v2 }
  0x3c   : > { %p445_p11 = pnand %p444_p2, %p440_p8 }
  0x3d   : > { %372 = vpow2.f32 %v183_v3 }
  0x43   : > { %v373_v6 = vpop.eup %372 }
  0x44   : > { %v185_v7 = vadd.f32 %v373_v6, %v179_v5 }
  0x46   : > { %374 = vrcp.f32 %v185_v7  ;;  %v197_v10 = vand.u32 2147483648, %v185_v7  ;;  %vm191_vm0 = vweird.f32 %v185_v7  ;;  %v195_v12 = vand.u32 2147483647, %v185_v7 }
  0x48   : > { %v198_v14 = vor.u32 1.1754944e-38, %v197_v10  ;;  %vm196_vm3 = vcmp.eq.f32.partialorder %v195_v12, 8.507059e+37 }
  0x4c   : > { %v375_v8 = vpop.eup %374 }
  0x4d   : > { %v187_v9 = vmul.f32 %v375_v8, %v185_v7  ;;  %vm192_vm1 = vweird.f32 %v375_v8 }
  0x4e   : > { %vm193_vm2 = vmor %vm191_vm0, %vm192_vm1 }
  0x4f   : > { %v188_v11 = vsub.f32 1.0, %v187_v9 }
  0x51   : > { %v189_v13 = vmul.f32 %v375_v8, %v188_v11 }
  0x53   : > { %v190_v15 = vadd.f32 %v375_v8, %v189_v13 }
  0x55   : > { %v194_v16 = vsel %vm193_vm2, %v375_v8, %v190_v15 }
  0x56   : > { %v199_v17 = vsel %vm196_vm3, %v198_v14, %v194_v16 }
  0x57   : > { %v200_v18 = vmul.f32 %v199_v17, %v177_v0 }
  0x59   : > { %201 = vst [vmem:[%s174_s14] sm:$0xff] %v200_v18 }
  0x5a   : > { %448 = shalt.err (!%p445_p11)
}
  0x5b   : > { %321 = dma.vmem_to_hbm [thread:$0]  (%p575_p3), %s216_s17, 128, %s218_s18, %s203_s13  }
  0x5c PF: > { %s229_s27 = sand.u32 1, %s479_s9   ;;  %p659_p12 = scmp.ge.s32.totalorder %s491_s12, 2 }
  0x5d   : > { %s230_s3 = scalar_lea.sflag [#allocation4], %s229_s27 }
  0x5e   : > { %p332_p13 = pnand %p659_p12, %p544_p6 }
  0x60   : > { %p333_p0 = pneg %p332_p13 }
  0x62   : > { %474 = dma.done.wait (%p333_p0), %s230_s3, 128  }
  0x63   : > { %476 = vsyncadd (%p333_p0), %s230_s3, 4294967168  ;;  %p16_p5 = scmp.ge.s32.totalorder %s560_s21, 4   ;;  %s660_s9 = smov %s483_s10 }
  0x64   : > { %s661_s10 = smov %s487_s11  ;;  %s662_s11 = smov %s570_s25 }
  0x65   : > { %s663_s12 = smov %s560_s21  ;;  %18 = sbr.rel (!%p16_p5) target bundleno = 6 (0x6), region = 78 }
  0x6a   :  { %236 = vsyncpa [#allocation3], 1 }
  0x6b   :  { %238 = vsyncpa [#allocation3 + $0x1], 1 }
  0x6c   :  { %239 = vsyncpa [#allocation4], 1 }
  0x6d   :  { %241 = vsyncpa [#allocation4 + $0x1], 1 }
  0x6e   :  { %242 = vsyncpa [#allocation5], 1 }
  0x6f   :  { %244 = vsyncpa [#allocation5 + $0x1], 1 }

</bundles_post_ra>
